<compile_context>
chip_gen: v7x
topology: tpu7x:2x2x1
jax: 0.10.0
libtpu: 0.0.40
codegen_flags: <defaults>
</compile_context>

<pallas_src>
import numpy as np
import jax
import jax.numpy as jnp
from jax.experimental import pallas as pl
from jax.experimental.pallas import tpu as pltpu

_LANE = 128


def _multibox_loss_kernel(slab_ref, out_ref):
    # slab_ref : [11, R, 128] f32, anchor j -> (j // 128, j % 128)
    #   rows 0:2  -> class logits (class 0, class 1)
    #   rows 2:6  -> regression predictions
    #   row  6    -> class target label (-1 / 0 / 1)
    #   rows 7:11 -> regression targets
    # out_ref : SMEM (2,) f32 -> (closs, rloss)
    slab = slab_ref[...]                       # [11, R, 128]

    logits0 = slab[0]                          # [R, 128]
    logits1 = slab[1]                          # [R, 128]
    tcls = slab[6]                             # [R, 128]

    is_pos = tcls == 1.0
    is_neg = tcls == 0.0

    # Binary cross-entropy via stable softplus:
    #   CE = log(exp(l0) + exp(l1)) - l_sel = softplus(l_other - l_sel)
    x = jnp.where(is_pos, logits0 - logits1, logits1 - logits0)
    ce = jnp.maximum(x, 0.0) + jnp.log(1.0 + jnp.exp(-jnp.abs(x)))

    valid = jnp.where(jnp.logical_or(is_pos, is_neg), 1.0, 0.0)
    closs = jnp.sum(ce * valid) * (1.0 / 64.0)

    # Smooth-L1 regression loss (beta = 1).
    d = slab[2:6] - slab[7:11]                 # [4, R, 128]
    ad = jnp.abs(d)
    sl1 = jnp.where(ad < 1.0, 0.5 * d * d, ad - 0.5)
    per_anchor = jnp.sum(sl1, axis=0)          # [R, 128]
    pos_mask = jnp.where(is_pos, 1.0, 0.0)
    # (sum_j sl1 / 4) summed over positives / 16  ==  masked sum / 64
    rloss = jnp.sum(per_anchor * pos_mask) * (1.0 / 64.0)

    out_ref[0] = closs
    out_ref[1] = rloss


@jax.jit
def _multibox_loss_pallas(cout, rout, targets):
    """cout [N,2], rout [N,4], targets [N,5] -> (closs, rloss, loss) scalars."""
    cout = jnp.asarray(cout, jnp.float32)
    rout = jnp.asarray(rout, jnp.float32)
    targets = jnp.asarray(targets, jnp.float32)

    n = cout.shape[0]
    n_pad = ((n + _LANE - 1) // _LANE) * _LANE
    r = n_pad // _LANE

    # One contiguous [N, 11] slab: logits(2) | reg pred(4) | label(1) | reg tgt(4).
    slab = jnp.concatenate([cout, rout, targets], axis=1)       # [N, 11]
    if n_pad != n:
        # Padded anchors get label -1 (ignored) and zero regression residual.
        pad = jnp.zeros((n_pad - n, 11), jnp.float32).at[:, 6].set(-1.0)
        slab = jnp.concatenate([slab, pad], axis=0)
    slab = slab.T.reshape(11, r, _LANE)                         # [11, R, 128]

    out = pl.pallas_call(
        _multibox_loss_kernel,
        out_shape=jax.ShapeDtypeStruct((2,), jnp.float32),
        in_specs=[pl.BlockSpec(memory_space=pltpu.MemorySpace.VMEM)],
        out_specs=pl.BlockSpec(memory_space=pltpu.MemorySpace.SMEM),
    )(slab)

    closs = out[0]
    rloss = out[1]
    return closs, rloss, closs + rloss


def multibox_loss_forward(predictions, targets):
    """Full forward matching the PyTorch module's return signature."""
    cout, rout = predictions

    # Dispatch the kernel first (async) ...
    closs, rloss, loss = _multibox_loss_pallas(cout, rout, targets)
    reg_pred = jnp.asarray(rout, jnp.float32)
    reg_target = jnp.asarray(targets, jnp.float32)[:, 1:]

    # ... then do the host-side index extraction (device->host sync) while the
    # device is already computing the losses.
    targets_np = np.asarray(targets)
    class_target = targets_np[:, 0].astype(np.int64)
    pos_index = list(np.where(class_target == 1)[0])
    neg_index = list(np.where(class_target == 0)[0])

    return closs, rloss, loss, reg_pred, reg_target, pos_index, neg_index


def _reference(cout, rout, targets):
    """Pure-numpy reference of the PyTorch forward for verification."""
    cout = np.asarray(cout, np.float64)
    rout = np.asarray(rout, np.float64)
    targets = np.asarray(targets, np.float64)
    ct = targets[:, 0].astype(np.int64)
    pos = np.where(ct == 1)[0]
    neg = np.where(ct == 0)[0]
    sel = np.concatenate([pos, neg]).astype(np.int64)
    logits = cout[sel]
    labels = ct[sel]
    lse = np.log(np.exp(logits).sum(axis=1))
    ce = lse - logits[np.arange(len(sel)), labels]
    closs = ce.sum() / 64.0
    d = rout - targets[:, 1:]
    ad = np.abs(d)
    sl1 = np.where(ad < 1.0, 0.5 * d * d, ad - 0.5)
    per = sl1.sum(axis=1) / 4.0
    rloss = per[pos].sum() / 16.0
    return closs, rloss, closs + rloss


if __name__ == "__main__":
    N = 256  # number of anchors
    key = jax.random.PRNGKey(0)
    k1, k2, k3, k4 = jax.random.split(key, 4)

    cout = jax.random.normal(k1, (N, 2), jnp.float32)
    rout = jax.random.normal(k2, (N, 4), jnp.float32)
    # class labels in {-1, 0, 1}, regression targets gaussian
    labels = jax.random.randint(k3, (N, 1), -1, 2).astype(jnp.float32)
    reg_t = jax.random.normal(k4, (N, 4), jnp.float32)
    targets = jnp.concatenate([labels, reg_t], axis=1)  # [N, 5]

    closs, rloss, loss, reg_pred, reg_target, pos_index, neg_index = \
        multibox_loss_forward((cout, rout), targets)
    jax.block_until_ready((closs, rloss, loss, reg_pred, reg_target))

    closs_ref, rloss_ref, loss_ref = _reference(cout, rout, targets)
    np.testing.assert_allclose(float(closs), closs_ref, rtol=1e-4, atol=1e-4)
    np.testing.assert_allclose(float(rloss), rloss_ref, rtol=1e-4, atol=1e-4)
    np.testing.assert_allclose(float(loss), loss_ref, rtol=1e-4, atol=1e-4)
    np.testing.assert_allclose(np.asarray(reg_pred), np.asarray(rout),
                               rtol=1e-6, atol=1e-6)
    np.testing.assert_allclose(np.asarray(reg_target),
                               np.asarray(targets)[:, 1:], rtol=1e-6, atol=1e-6)

    print("KERNEL_OK")
</pallas_src>

<mosaic_0001>
module attributes {stable_mosaic.version = 11 : i64} {
  func.func @_multibox_loss_kernel(%arg0: memref<11x2x128xf32, #tpu.memory_space<vmem>>, %arg1: memref<2xf32, #tpu.memory_space<smem>>) attributes {dimension_semantics = [], scalar_prefetch = 0 : i64, scratch_operands = 0 : i64, tpu.core_type = #tpu.core_type<tc>} {
    %c0 = arith.constant 0 : index
    %c0_0 = arith.constant 0 : index
    %c0_1 = arith.constant 0 : index
    %0 = vector.load %arg0[%c0, %c0_0, %c0_1] : memref<11x2x128xf32, #tpu.memory_space<vmem>>, vector<11x2x128xf32>
    %1 = vector.extract_strided_slice %0 {offsets = [0, 0, 0], sizes = [1, 2, 128], strides = [1, 1, 1]} : vector<11x2x128xf32> to vector<1x2x128xf32>
    %2 = vector.shape_cast %1 : vector<1x2x128xf32> to vector<2x128xf32>
    %3 = vector.extract_strided_slice %0 {offsets = [1, 0, 0], sizes = [1, 2, 128], strides = [1, 1, 1]} : vector<11x2x128xf32> to vector<1x2x128xf32>
    %4 = vector.shape_cast %3 : vector<1x2x128xf32> to vector<2x128xf32>
    %5 = vector.extract_strided_slice %0 {offsets = [6, 0, 0], sizes = [1, 2, 128], strides = [1, 1, 1]} : vector<11x2x128xf32> to vector<1x2x128xf32>
    %6 = vector.shape_cast %5 : vector<1x2x128xf32> to vector<2x128xf32>
    %cst = arith.constant 1.000000e+00 : f32
    %7 = vector.broadcast %cst : f32 to vector<2x128xf32>
    %8 = arith.cmpf oeq, %6, %7 : vector<2x128xf32>
    %cst_2 = arith.constant 0.000000e+00 : f32
    %9 = vector.broadcast %cst_2 : f32 to vector<2x128xf32>
    %10 = arith.cmpf oeq, %6, %9 : vector<2x128xf32>
    %11 = arith.subf %2, %4 : vector<2x128xf32>
    %12 = arith.subf %4, %2 : vector<2x128xf32>
    %13 = arith.select %8, %11, %12 : vector<2x128xi1>, vector<2x128xf32>
    %cst_3 = arith.constant 0.000000e+00 : f32
    %14 = vector.broadcast %cst_3 : f32 to vector<2x128xf32>
    %15 = arith.maximumf %13, %14 : vector<2x128xf32>
    %16 = math.absf %13 : vector<2x128xf32>
    %cst_4 = arith.constant 0.000000e+00 : f32
    %17 = vector.broadcast %cst_4 : f32 to vector<2x128xf32>
    %18 = arith.subf %17, %16 : vector<2x128xf32>
    %19 = math.exp %18 : vector<2x128xf32>
    %cst_5 = arith.constant 1.000000e+00 : f32
    %20 = vector.broadcast %cst_5 : f32 to vector<2x128xf32>
    %21 = arith.addf %20, %19 : vector<2x128xf32>
    %22 = math.log %21 : vector<2x128xf32>
    %23 = arith.addf %15, %22 : vector<2x128xf32>
    %24 = arith.ori %8, %10 : vector<2x128xi1>
    %cst_6 = arith.constant 1.000000e+00 : f32
    %cst_7 = arith.constant 0.000000e+00 : f32
    %25 = vector.broadcast %cst_6 : f32 to vector<2x128xf32>
    %26 = vector.broadcast %cst_7 : f32 to vector<2x128xf32>
    %27 = arith.select %24, %25, %26 : vector<2x128xi1>, vector<2x128xf32>
    %28 = arith.mulf %23, %27 : vector<2x128xf32>
    %29 = vector.shape_cast %28 : vector<2x128xf32> to vector<1x2x128xf32>
    %cst_8 = arith.constant dense<0.000000e+00> : vector<1xf32>
    %30 = vector.multi_reduction <add>, %29, %cst_8 [1, 2] : vector<1x2x128xf32> to vector<1xf32>
    %31 = vector.shape_cast %30 : vector<1xf32> to vector<1x1x1xf32>
    %32 = vector.extract %31[0, 0, 0] : f32 from vector<1x1x1xf32>
    %cst_9 = arith.constant 1.562500e-02 : f32
    %33 = arith.mulf %32, %cst_9 : f32
    %34 = vector.extract_strided_slice %0 {offsets = [2, 0, 0], sizes = [4, 2, 128], strides = [1, 1, 1]} : vector<11x2x128xf32> to vector<4x2x128xf32>
    %35 = vector.extract_strided_slice %0 {offsets = [7, 0, 0], sizes = [4, 2, 128], strides = [1, 1, 1]} : vector<11x2x128xf32> to vector<4x2x128xf32>
    %36 = arith.subf %34, %35 : vector<4x2x128xf32>
    %37 = math.absf %36 : vector<4x2x128xf32>
    %cst_10 = arith.constant 1.000000e+00 : f32
    %38 = vector.broadcast %cst_10 : f32 to vector<4x2x128xf32>
    %39 = arith.cmpf olt, %37, %38 : vector<4x2x128xf32>
    %cst_11 = arith.constant 5.000000e-01 : f32
    %40 = vector.broadcast %cst_11 : f32 to vector<4x2x128xf32>
    %41 = arith.mulf %40, %36 : vector<4x2x128xf32>
    %42 = arith.mulf %41, %36 : vector<4x2x128xf32>
    %cst_12 = arith.constant 5.000000e-01 : f32
    %43 = vector.broadcast %cst_12 : f32 to vector<4x2x128xf32>
    %44 = arith.subf %37, %43 : vector<4x2x128xf32>
    %45 = arith.select %39, %42, %44 : vector<4x2x128xi1>, vector<4x2x128xf32>
    %cst_13 = arith.constant dense<0.000000e+00> : vector<2x128xf32>
    %46 = vector.multi_reduction <add>, %45, %cst_13 [0] : vector<4x2x128xf32> to vector<2x128xf32>
    %cst_14 = arith.constant 1.000000e+00 : f32
    %cst_15 = arith.constant 0.000000e+00 : f32
    %47 = vector.broadcast %cst_14 : f32 to vector<2x128xf32>
    %48 = vector.broadcast %cst_15 : f32 to vector<2x128xf32>
    %49 = arith.select %8, %47, %48 : vector<2x128xi1>, vector<2x128xf32>
    %50 = arith.mulf %46, %49 : vector<2x128xf32>
    %51 = vector.shape_cast %50 : vector<2x128xf32> to vector<1x2x128xf32>
    %cst_16 = arith.constant dense<0.000000e+00> : vector<1xf32>
    %52 = vector.multi_reduction <add>, %51, %cst_16 [1, 2] : vector<1x2x128xf32> to vector<1xf32>
    %53 = vector.shape_cast %52 : vector<1xf32> to vector<1x1x1xf32>
    %54 = vector.extract %53[0, 0, 0] : f32 from vector<1x1x1xf32>
    %cst_17 = arith.constant 1.562500e-02 : f32
    %55 = arith.mulf %54, %cst_17 : f32
    %c0_18 = arith.constant 0 : index
    %56 = memref.load %arg1[%c0_18] : memref<2xf32, #tpu.memory_space<smem>>
    memref.store %33, %arg1[%c0_18] : memref<2xf32, #tpu.memory_space<smem>>
    %c1 = arith.constant 1 : index
    %57 = memref.load %arg1[%c1] : memref<2xf32, #tpu.memory_space<smem>>
    memref.store %55, %arg1[%c1] : memref<2xf32, #tpu.memory_space<smem>>
    return
  }
}

</mosaic_0001>

<bundles_post_ra>
// kernel: _multibox_loss_pallas.1
= control target key start
LH: loop header
LB: loop body
LE: loop exit
PB: predicated region body
PF: predicated region fallthrough
CT: control target
= control target key end

     0   :  { %s208_s0 = inlined_call_operand.vmem [shape: f32[11,2,128], index: 0, kind: input, shape index: {}]   ;;  %s209_s1 = inlined_call_operand.vmem [shape: f32[2], index: 1, kind: output, shape index: {}]  }
   0x1   :  { %v9_v0 = vld [vmem:[%s208_s0] sm:$0x3]  ;;  %v10_v1 = vld [vmem:[%s208_s0 + $0x2] sm:$0x3]  ;;  %v165_v2 = vld [vmem:[%s208_s0 + $0xc] sm:$0x3] }
   0x2   :  { %vm20_vm0 = vcmp.eq.f32.partialorder %v165_v2, 1.0  ;;  %v22_v3 = vsub.f32 %v9_v0, %v10_v1  ;;  %v23_v4 = vsub.f32 %v10_v1, %v9_v0  ;;  %v11_v7 = vld [vmem:[%s208_s0 + $0x4] sm:$0x3]  ;;  %v12_v8 = vld [vmem:[%s208_s0 + $0x6] sm:$0x3] }
   0x3   :  { %v16_v9 = vld [vmem:[%s208_s0 + $0xe] sm:$0x3]  ;;  %v17_v10 = vld [vmem:[%s208_s0 + $0x10] sm:$0x3] }
   0x4   :  { %v24_v5 = vsel %vm20_vm0, %v22_v3, %v23_v4 }
   0x5   :  { %v26_v6 = vand.u32 2147483647, %v24_v5 }
   0x6   :  { %6 = vsyncpa [#allocation3], 0  ;;  %v13_v13 = vld [vmem:[%s208_s0 + $0x8] sm:$0x3]  ;;  %v18_v14 = vld [vmem:[%s208_s0 + $0x12] sm:$0x3]  ;;  %v49_v15 = vsub.f32 %v11_v7, %v16_v9  ;;  %v50_v16 = vsub.f32 %v12_v8, %v17_v10 }
   0x7   :  { %v27_v11 = vsub.f32 0.0, %v26_v6  ;;  %v14_v17 = vld [vmem:[%s208_s0 + $0xa] sm:$0x3]  ;;  %v19_v18 = vld [vmem:[%s208_s0 + $0x14] sm:$0x3]  ;;  %v51_v19 = vsub.f32 %v13_v13, %v18_v14  ;;  %vm37_vm3 = vcmask 1041408  }
   0x8   :  { %v53_v20 = vand.u32 2147483647, %v49_v15  ;;  %v54_v21 = vand.u32 2147483647, %v50_v16  ;;  %v61_v22 = vmul.f32 0.5, %v49_v15  ;;  %v62_v23 = vmul.f32 0.5, %v50_v16 }
   0x9   :  { %v28_v12 = vmul.f32 1.442695, %v27_v11  ;;  %v52_v24 = vsub.f32 %v14_v17, %v19_v18  ;;  %v55_v25 = vand.u32 2147483647, %v51_v19  ;;  %v63_v26 = vmul.f32 0.5, %v51_v19  ;;  %s107_s2 = sshll.u32 %s209_s1, 4  ;;  %s108_s2 = int_to_ptr.vmem [resolvable:$true] %s107_s2 }
   0xa   :  { %v65_v27 = vmul.f32 %v61_v22, %v49_v15  ;;  %v66_v28 = vmul.f32 %v62_v23, %v50_v16  ;;  %v116_v29 = vadd.f32 -0.5, %v53_v20  ;;  %v117_v30 = vadd.f32 -0.5, %v54_v21  ;;  %s130_s5 = scalar_lea.vmem %s108_s2, 16  ;;  %p135_p1 = scmp.lt.s32.totalorder %s108_s2, %s108_s2 }
   0xb   :  { %126 = vpow2.f32 %v28_v12  ;;  %vm57_vm1 = vcmp.lt.f32.partialorder %v53_v20, 1.0  ;;  %vm58_vm2 = vcmp.lt.f32.partialorder %v54_v21, 1.0  ;;  %v56_v31 = vand.u32 2147483647, %v52_v24  ;;  %p131_p0 = scmp.ne.s32.totalorder %s108_s2, %s130_s5  ;;  %p136_p2 = scmp.lt.s32.totalorder %s130_s5, %s130_s5 }
   0xc   :  { %v64_v32 = vmul.f32 0.5, %v52_v24  ;;  %v67_v34 = vmul.f32 %v63_v26, %v51_v19  ;;  %v118_v35 = vadd.f32 -0.5, %v55_v25  ;;  %v73_v36 = vsel %vm57_vm1, %v65_v27, %v116_v29 }
   0xd   :  { %v74_v37 = vsel %vm58_vm2, %v66_v28, %v117_v30  ;;  %vm59_vm4 = vcmp.lt.f32.partialorder %v55_v25, 1.0  ;;  %v77_v39 = vsel %vm37_vm3, %v73_v36, 0.0  ;;  %v119_v42 = vadd.f32 -0.5, %v56_v31  ;;  %p137_p3 = por %p136_p2, %p135_p1 }
   0xe   :  { %v78_v40 = vsel %vm37_vm3, %v74_v37, 0.0  ;;  %v68_v41 = vmul.f32 %v64_v32, %v52_v24  ;;  %v75_v43 = vsel %vm59_vm4, %v67_v34, %v118_v35  ;;  %vm60_vm5 = vcmp.lt.f32.partialorder %v56_v31, 1.0 }
   0xf   :  { %v79_v44 = vadd.f32 %v78_v40, %v77_v39  ;;  %v80_v45 = vsel %vm37_vm3, %v75_v43, 0.0  ;;  %vm21_vm6 = vcmp.eq.f32.partialorder %v165_v2, 0.0  ;;  %v25_v49 = vmax.f32 %v24_v5, 0.0  ;;  %p138_p4 = pnand %p137_p3, %p131_p0 }
  0x10   :  { %v76_v46 = vsel %vm60_vm5, %v68_v41, %v119_v42  ;;  %vm34_vm7 = vmor %vm20_vm0, %vm21_vm6  ;;  %v144_v53 = vmov 0.0  }
  0x11   :  { %v81_v47 = vadd.f32 %v80_v45, %v79_v44  ;;  %v82_v48 = vsel %vm37_vm3, %v76_v46, 0.0  ;;  %v35_v54 = vsel %vm34_vm7, 1.0, %v144_v53  ;;  %v84_v55 = vsel %vm20_vm0, 1.0, %v144_v53 }
  0x13   :  { %v83_v52 = vadd.f32 %v82_v48, %v81_v47 }
  0x15   :  { %v127_v33 = vpop.eup %126  ;;  %v85_v58 = vmul.f32 %v84_v55, %v83_v52 }
  0x16   :  { %v30_v38 = vadd.f32 1.0, %v127_v33 }
  0x17   :  { %v86_v60 = vsel %vm37_vm3, %v85_v58, 0.0 }
  0x18   :  { %128 = vlog2.f32 %v30_v38 }
  0x22   :  { %v129_v50 = vpop.eup %128 }
  0x23   :  { %v32_v51 = vmul.f32 0.6931472, %v129_v50 }
  0x25   :  { %v33_v56 = vadd.f32 %v32_v51, %v25_v49 }
  0x27   :  { %v36_v57 = vmul.f32 %v35_v54, %v33_v56 }
  0x29   :  { %v38_v59 = vsel %vm37_vm3, %v36_v57, 0.0 }
  0x2a   :  { %39 = vadd.xlane.f32.xlu0 %v38_v59 }
  0x2e   :  { %87 = vadd.xlane.f32.xlu0 %v86_v60 }
  0xb7   :  { %v40_v61 = vpop.xlane.xlu0 %39 }
  0xb8   :  { %v41_v62 = vrot.slane %v40_v61, 4 }
  0xba   :  { %v42_v63 = vadd.f32 %v41_v62, %v40_v61 }
  0xbb   :  { %v88_v0 = vpop.xlane.xlu0 %87 }
  0xbc   :  { %v43_v1 = vrot.slane %v42_v63, 2  ;;  %v89_v3 = vrot.slane %v88_v0, 4 }
  0xbe   :  { %v90_v4 = vadd.f32 %v89_v3, %v88_v0  ;;  %v44_v5 = vadd.f32 %v43_v1, %v42_v63 }
  0xc0   :  { %v91_v6 = vrot.slane %v90_v4, 2  ;;  %v45_v2 = vrot.slane %v44_v5, 1 }
  0xc2   :  { %v92_v7 = vadd.f32 %v91_v6, %v90_v4  ;;  %v46_v8 = vadd.f32 %v45_v2, %v44_v5 }
  0xc4   :  { %120 = vpush %v46_v8  ;;  %v93_v9 = vrot.slane %v92_v7, 1 }
  0xc6   :  { %v94_v10 = vadd.f32 %v93_v9, %v92_v7 }
  0xc8   :  { %122 = vpush %v94_v10 }
  0xf5   :  { %s121_s0 = spop %120 }
  0xf6   :  { %s48_s28 = smul.f32 0.015625, %s121_s0 }
  0xf8   :  { %98 = sst [smem:[#allocation2]] %s48_s28 }
  0xf9   :  { %s123_s3 = spop %122 }
  0xfa   :  { %s96_s4 = smul.f32 0.015625, %s123_s3 }
  0xfc   :  { %100 = sst [smem:[#allocation2 + $0x1]] %s96_s4 }
  0xfd   :  { %141 = shalt.err (!%p138_p4)
}
  0xfe   :  { %s145_s6 = smov [#allocation2]  }
  0xff   :  { %110 = dma.smem_to_vmem %s145_s6, 16, %s108_s2, [#allocation3]  }
 0x100   :  { %142 = dma.done.wait [#allocation3], 16  }
 0x101   :  { %143 = vsyncadd [#allocation3], 4294967280 }
 0x102   :  { %114 = sfence }
 0x103   :  { %115 = vsyncpa [#allocation3], 1 }

</bundles_post_ra>
